<compile_context>
chip_gen: v6e
topology: v6e:2x2x1
jax: 0.10.0
libtpu: 0.0.40
codegen_flags: <defaults>
</compile_context>

<pallas_src>
import functools

import jax
import jax.numpy as jnp
from jax import lax
from jax.experimental import pallas as pl
from jax.experimental.pallas import tpu as pltpu


def _graph_build_kernel(x_ref, w_ref, o_ref, *, G: int, N: int, apply_threshold: bool):
    """One grid step: G graphs packed along the row (M / sublane) axis.

    x_ref: (1, G*N, D)  packed node embeddings for G graphs
    w_ref: (1, D)       shared similarity weight
    o_ref: (G, N, N)    per-graph adjacency
    """
    x = x_ref[0]                                     # (G*N, D)
    w = w_ref[...]                                   # (1, D) -> broadcast over rows
    h = jnp.maximum(x * w, 0.0)                      # F.relu(torch.mul(ebd, weight))
    # Single slab matmul h @ h.T with the transpose folded into the MXU
    # (contraction on the feature axis).
    s = lax.dot_general(
        h, h,
        dimension_numbers=(((1,), (1,)), ((), ())),
        preferred_element_type=jnp.float32,
    )                                                # (G*N, G*N)
    if apply_threshold:
        # adj_sparsification: torch.where(base_adj >= 0.1, base_adj, 0)
        # (the triu/topk values are computed but unused in the PyTorch code)
        s = jnp.where(s >= 0.1, s, jnp.zeros_like(s))
    if G == 1:
        o_ref[0] = s
    else:
        # Extract the G block-diagonal NxN tiles; cross-graph blocks are discarded
        # (never written to HBM).
        for g in range(G):
            o_ref[g] = s[g * N:(g + 1) * N, g * N:(g + 1) * N]


def _tpu_vmem_capacity_bytes() -> int:
    try:
        info = pltpu.get_tpu_info()
        for attr in ("vmem_capacity_bytes", "vmem_bytes", "vmem_size_bytes"):
            v = getattr(info, attr, None)
            if v:
                return int(v)
    except Exception:
        pass
    return 128 * 1024 * 1024  # v5e/v6e physical; v7x is 64 MiB (we stay far below)


def _vmem_need_bytes(G: int, N: int, D: int) -> int:
    in_blk = G * N * D * 4
    out_blk = G * N * N * 4
    inter = G * N * D * 4 + (G * N) ** 2 * 4         # h and s intermediates
    return 2 * (in_blk + out_blk) + inter + D * 4    # double-buffered blocks + scratch


def graph_build(ebd: jax.Array, similarity_weight: jax.Array, *, top_k: int) -> jax.Array:
    """ebd: (B, N, D) float32, similarity_weight: (D,) float32 -> (B, N, N) float32."""
    B, N, D = ebd.shape
    assert similarity_weight.shape == (D,)
    apply_threshold = (N * N) > top_k                # static, mirrors `if num > top_k`

    # --- choose G = graphs packed per grid step (always a divisor of B -> no padding)
    MIN_SLABS = 4          # keep grid >= 2 TensorCores (v7x) x 2 steps for pipelining
    TARGET_ROWS = 256      # fills the 256-wide MXU on v6e/v7x; two clean passes on v5e
    if N % 8 == 0 and N < TARGET_ROWS:
        g_rows = max(1, TARGET_ROWS // N)            # keep block-diag slices 8-aligned
    else:
        g_rows = 1
    g_grid = max(1, B // MIN_SLABS)
    budget = max(8 * 1024 * 1024, _tpu_vmem_capacity_bytes() // 4)  # generation-aware
    g_max = max(1, min(g_rows, g_grid, B))
    G = 1
    for g in range(g_max, 0, -1):                    # largest divisor of B that fits VMEM
        if B % g == 0 and _vmem_need_bytes(g, N, D) <= budget:
            G = g
            break
    S = B // G

    # Free (contiguous) reshape into S slabs of G*N rows; no N/D/B padding in HBM.
    x = jnp.asarray(ebd, jnp.float32).reshape(S, G * N, D)
    w2d = jnp.asarray(similarity_weight, jnp.float32).reshape(1, D)

    vmem_need = _vmem_need_bytes(G, N, D)
    compiler_kwargs = {}
    if vmem_need > 12 * 1024 * 1024:
        compiler_kwargs["vmem_limit_bytes"] = int(
            min(vmem_need * 3 // 2, _tpu_vmem_capacity_bytes() // 2))
    # TODO(synk): for very large N (N*N*4 approaching scoped VMEM, esp. v7x's 64 MiB)
    # the (N, N) adjacency should additionally be tiled over (row, col, k) grid axes
    # with a VMEM accumulator; not needed for the shapes implied by this module.

    kernel = functools.partial(
        _graph_build_kernel, G=G, N=N, apply_threshold=apply_threshold)

    cost = pl.CostEstimate(
        flops=2 * S * (G * N) ** 2 * D,                      # actual MXU work (packed)
        transcendentals=0,
        bytes_accessed=4 * (B * N * D + D + B * N * N),      # actual HBM traffic
    )

    adj = pl.pallas_call(
        kernel,
        out_shape=jax.ShapeDtypeStruct((B, N, N), jnp.float32),
        grid_spec=pltpu.PrefetchScalarGridSpec(
            num_scalar_prefetch=0,
            grid=(S,),
            in_specs=[
                pl.BlockSpec((1, G * N, D), lambda s: (s, 0, 0)),  # one packed slab
                pl.BlockSpec((1, D), lambda s: (0, 0)),            # shared weight vector
            ],
            out_specs=pl.BlockSpec((G, N, N), lambda s: (s, 0, 0)),
        ),
        compiler_params=pltpu.CompilerParams(
            dimension_semantics=("parallel",),
            **compiler_kwargs,
        ),
        cost_estimate=cost,
    )(x, w2d)
    return adj


def _reference(ebd, w, top_k):
    h = jnp.maximum(ebd * w[None, None, :], 0.0)
    adj = jnp.einsum("bnd,bmd->bnm", h, h)
    if ebd.shape[1] ** 2 > top_k:
        adj = jnp.where(adj >= 0.1, adj, 0.0)
    return adj


if __name__ == "__main__":
    D = 300  # fixed by the similarity_weight parameter in the module

    def run_case(B, N, top_k, seed):
        k_x, k_w = jax.random.split(jax.random.PRNGKey(seed))
        ebd = jax.random.normal(k_x, (B, N, D), dtype=jnp.float32) * 0.1
        w = jax.random.normal(k_w, (D,), dtype=jnp.float32)      # torch.randn(300)
        adj = jax.block_until_ready(graph_build(ebd, w, top_k=top_k))
        ref = _reference(ebd, w, top_k)
        assert adj.shape == (B, N, N)
        assert jnp.allclose(adj, ref, atol=1e-4, rtol=1e-4), f"mismatch B={B} N={N}"

    # Primary small config consistent with the module (B=2 graphs, N=16 nodes, D=300):
    run_case(2, 16, 20, 0)      # G=1 per step, grid=(2,), thresholding path
    # Packed-slab path (G>1, block-diagonal extraction), thresholding on:
    run_case(16, 16, 20, 1)
    # Packed-slab path with N*N <= top_k (no thresholding branch):
    run_case(8, 16, 1000, 2)

    # TODO(synk): DGL graph mutation (add_edges / add_self_loop / batch) is host-side
    # graph bookkeeping with no Pallas equivalent; edges = adj.nonzero() downstream.
    print("KERNEL_OK")
</pallas_src>

<mosaic_0001>
module attributes {stable_mosaic.version = 11 : i64} {
  func.func @_graph_build_kernel(%arg0: i32, %arg1: memref<1x16x300xf32, #tpu.memory_space<vmem>>, %arg2: memref<1x300xf32, #tpu.memory_space<vmem>>, %arg3: memref<1x16x16xf32, #tpu.memory_space<vmem>>) attributes {dimension_semantics = [#tpu.dimension_semantics<parallel>], iteration_bounds = array<i64: 2>, scalar_prefetch = 0 : i64, scratch_operands = 0 : i64, tpu.core_type = #tpu.core_type<tc>, window_params = [{transform_indices = @transform_0, window_bounds = array<i64: 1, 16, 300>}, {pipeline_mode = #tpu.pipeline_mode<synchronous>, transform_indices = @transform_1, window_bounds = array<i64: 1, 300>}, {transform_indices = @transform_2, window_bounds = array<i64: 1, 16, 16>}]} {
    %c0 = arith.constant 0 : index
    %c0_0 = arith.constant 0 : index
    %c0_1 = arith.constant 0 : index
    %0 = vector.load %arg1[%c0, %c0_0, %c0_1] : memref<1x16x300xf32, #tpu.memory_space<vmem>>, vector<1x16x300xf32>
    %1 = vector.shape_cast %0 : vector<1x16x300xf32> to vector<16x300xf32>
    %c0_2 = arith.constant 0 : index
    %c0_3 = arith.constant 0 : index
    %2 = vector.load %arg2[%c0_2, %c0_3] : memref<1x300xf32, #tpu.memory_space<vmem>>, vector<1x300xf32>
    %3 = vector.broadcast %2 : vector<1x300xf32> to vector<16x300xf32>
    %4 = arith.mulf %1, %3 : vector<16x300xf32>
    %cst = arith.constant 0.000000e+00 : f32
    %5 = vector.broadcast %cst : f32 to vector<16x300xf32>
    %6 = arith.maximumf %4, %5 : vector<16x300xf32>
    %cst_4 = arith.constant dense<0.000000e+00> : vector<16x16xf32>
    %7 = tpu.matmul %6, %6, %cst_4 {dimension_numbers = #tpu.dot_dimension_numbers<[1], [1], [0], [0], [0, 0, 1, 0], [], []>} : vector<16x300xf32>, vector<16x300xf32>, vector<16x16xf32> -> vector<16x16xf32>
    %cst_5 = arith.constant 1.000000e-01 : f32
    %8 = vector.broadcast %cst_5 : f32 to vector<16x16xf32>
    %9 = arith.cmpf oge, %7, %8 : vector<16x16xf32>
    %cst_6 = arith.constant 0.000000e+00 : f32
    %10 = vector.broadcast %cst_6 : f32 to vector<16x16xf32>
    %11 = arith.select %9, %7, %10 : vector<16x16xi1>, vector<16x16xf32>
    %c0_7 = arith.constant 0 : index
    %c0_8 = arith.constant 0 : index
    %c0_9 = arith.constant 0 : index
    %12 = vector.load %arg3[%c0_7, %c0_8, %c0_9] : memref<1x16x16xf32, #tpu.memory_space<vmem>>, vector<1x16x16xf32>
    %13 = vector.shape_cast %12 : vector<1x16x16xf32> to vector<16x16xf32>
    %14 = vector.shape_cast %11 : vector<16x16xf32> to vector<1x16x16xf32>
    tpu.vector_store %arg3[%c0_7, %c0_8, %c0_9], %14 {strides = array<i32>} : memref<1x16x16xf32, #tpu.memory_space<vmem>>, vector<1x16x16xf32>,
    return
  }
  func.func @transform_0(%arg0: i32) -> (i32, i32, i32) {
    %c0_i32 = arith.constant 0 : i32
    %c0_i32_0 = arith.constant 0 : i32
    %c0_i32_1 = arith.constant 0 : i32
    return %arg0, %c0_i32, %c0_i32_0 : i32, i32, i32
  }
  func.func @transform_1(%arg0: i32) -> (i32, i32) {
    %c0_i32 = arith.constant 0 : i32
    %c0_i32_0 = arith.constant 0 : i32
    %c0_i32_1 = arith.constant 0 : i32
    return %c0_i32, %c0_i32_0 : i32, i32
  }
  func.func @transform_2(%arg0: i32) -> (i32, i32, i32) {
    %c0_i32 = arith.constant 0 : i32
    %c0_i32_0 = arith.constant 0 : i32
    %c0_i32_1 = arith.constant 0 : i32
    return %arg0, %c0_i32, %c0_i32_0 : i32, i32, i32
  }
}

</mosaic_0001>

<bundles_post_ra>
// kernel: tpu_custom_call.1
= control target key start
LH: loop header
LB: loop body
LE: loop exit
PB: predicated region body
PF: predicated region fallthrough
CT: control target
= control target key end

     0   :  { %7 = vsyncpa [#allocation3], 0  ;;  %s898_s0 = inlined_call_operand.hbm [shape: f32[2,16,300], index: 0, kind: input, shape index: {}]   ;;  %s899_s1 = inlined_call_operand.hbm [shape: f32[1,300], index: 1, kind: input, shape index: {}]   ;;  %s900_s2 = inlined_call_operand.hbm [shape: f32[2,16,16], index: 2, kind: output, shape index: {}]  }
   0x1   :  { %9 = vsyncpa [#allocation3 + $0x1], 0 }
   0x2   :  { %10 = vsyncpa [#allocation6], 0 }
   0x3   :  { %11 = vsyncpa [#allocation4], 0 }
   0x4   :  { %13 = vsyncpa [#allocation4 + $0x1], 0  ;;  %s710_s9 = smov 0   ;;  %s712_s10 = smov 0  }
   0x5   :  { %s714_s11 = smov 0   ;;  %s716_s12 = smov 0  }
   0x6 LB: > { %s731_s13 = sadd.s32 4294967295, %s686_s12   ;;  %s471_s14 = sadd.s32 4294967294, %s686_s12   ;;  %s686_s12 = sphi %s716_s12, %s923_s12   ;;  %s682_s11 = sphi %s714_s11, %s922_s11   ;;  %s678_s10 = sphi %s712_s10, %s921_s10   ;;  %s674_s9 = sphi %s710_s9, %s920_s9  }
   0x7   : > { %s735_s15 = sadd.s32 1, %s686_s12   ;;  %s26_s16 = sadd.s32 1, %s682_s11 }
   0x8   : > { %s23_s17 = ssub.s32 %s686_s12, %s735_s15  ;;  %p33_p0 = scmp.ne.s32.totalorder %s682_s11, %s678_s10 }
   0x9   : > { %p24_p1 = scmp.eq.s32.totalorder %s23_s17, 0  ;;  %p34_p2 = scmp.eq.s32.totalorder %s686_s12, 0 }
   0xa   : > { %p39_p3 = scmp.ne.s32.totalorder %s678_s10, %s674_s9  ;;  %p901_p4 = scmp.eq.s32.totalorder %s731_s13, 0 }
   0xb   : > { %s747_s18 = scalar_select %p24_p1, %s682_s11, %s26_s16  }
   0xc   : > { %p749_p5 = por %p34_p2, %p33_p0  ;;  %p755_p6 = por %p901_p4, %p39_p3 }
   0xd   : > { %p84_p7 = scmp.eq.s32.totalorder %s731_s13, 1  ;;  %p90_p8 = scmp.eq.s32.totalorder %s471_s14, 1 }
   0xe   : > { %s906_s20 = scalar_select %p755_p6, 1, 0 }
   0xf   : > { %p472_p9 = scmp.ge.s32.totalorder %s686_s12, 1  ;;  %p97_p10 = scmp.lt.s32.totalorder %s686_s12, 3 }
  0x10   : > { %p762_p11 = por %p84_p7, %p33_p0  ;;  %p766_p12 = por %p90_p8, %p39_p3 }
  0x11   : > { %p770_p13 = pnand %p472_p9, %p97_p10  ;;  %s688_s24 = smov [#allocation5]  }
  0x12   : > { %s907_s21 = scalar_select %p762_p11, 1, 0 }
  0x13   : > { %s908_s22 = scalar_select %p766_p12, 1, 0 }
  0x14   : > { %s909_s23 = scalar_select %p770_p13, 1, 0 }
  0x15   : > { %p511_p2 = pneg %p770_p13  ;;  %s110_s25 = sshll.u32 %s688_s24, 4  ;;  %s111_s25 = int_to_ptr.vmem [resolvable:$true] %s110_s25 }
  0x16   : > { %p524_p4 = scmp.lt.s32.totalorder %s686_s12, 2  ;;  %p910_p0 = scmp.eq.s32.totalorder %s731_s13, 0 }
  0x17   : > { %s121_s27 = sand.u32 1, %s682_s11   ;;  %s575_s30 = scalar_lea.vmem %s111_s25, 48 }
  0x18   : > { %p780_p7 = pnand %p511_p2, %p910_p0  ;;  %p787_p3 = pnand %p524_p4, %p749_p5 }
  0x19   : > { %s500_s29 = smul.u32 48, %s121_s27  ;;  %p576_p9 = scmp.ne.s32.totalorder %s111_s25, %s575_s30 }
  0x1a   : > { %p566_p8 = pneg %p780_p7  ;;  %s582_s3 = scalar_lea.vmem %s111_s25, 64 }
  0x1b   : > { %p583_p12 = scmp.lt.s32.totalorder %s111_s25, %s111_s25  ;;  %p584_p2 = scmp.lt.s32.totalorder %s582_s3, %s575_s30 }
  0x1c   : > { %p578_p10 = pnand %p576_p9, %p566_p8 }
  0x1d   : > { %p585_p0 = por %p584_p2, %p583_p12 }
  0x1e   : > { %p579_p1 = pneg %p578_p10 }
  0x20   : > { %p586_p11 = pnand %p585_p0, %p579_p1 }
  0x22   : > { %589 = shalt.err (!%p586_p11)
}
  0x23   : > { %514 = dma.hbm_to_vmem [thread:$0]  (!%p780_p7), %s899_s1, 48, %s111_s25, [#allocation6]  }
  0x24   : > { %s501_s6 = smul.u32 768, %s686_s12  ;;  %s125_s7 = scalar_lea.vmem [#allocation2], %s500_s29 }
  0x25   : > { %s132_s8 = sshll.u32 %s125_s7, 4  ;;  %s806_s19 = scalar_lea.sflag [#allocation3], %s121_s27  ;;  %s799_s8 = int_to_ptr.vmem [resolvable:$true] %s132_s8 }
  0x26   : > { %s804_s17 = scalar_lea.hbm %s898_s0, %s501_s6  ;;  %p592_p5 = pneg %p787_p3 }
  0x27   : > { %s590_s24 = scalar_lea.hbm %s804_s17, 768  ;;  %s595_s29 = scalar_lea.hbm %s898_s0, 1536 }
  0x28   : > { %p591_p4 = scmp.ne.s32.totalorder %s804_s17, %s590_s24  ;;  %p596_p1 = scmp.lt.s32.totalorder %s804_s17, %s898_s0 }
  0x29   : > { %p597_p7 = scmp.lt.s32.totalorder %s595_s29, %s590_s24 }
  0x2a   : > { %p593_p11 = pnand %p592_p5, %p591_p4 }
  0x2b   : > { %p598_p8 = por %p597_p7, %p596_p1 }
  0x2c   : > { %p594_p12 = pneg %p593_p11 }
  0x2e   : > { %p599_p9 = pnand %p598_p8, %p594_p12 }
  0x30   : > { %602 = shalt.err (!%p599_p9)
}
  0x31   : > { %s603_s27 = scalar_lea.vmem %s799_s8, 768  ;;  %s689_s4 = smov [#allocation2]  }
  0x32   : > { %p604_p10 = scmp.ne.s32.totalorder %s799_s8, %s603_s27  ;;  %s608_s5 = sshll.u32 %s689_s4, 4  ;;  %s609_s5 = int_to_ptr.vmem [resolvable:$false] %s608_s5 }
  0x33   : > { %s610_s6 = scalar_lea.vmem %s609_s5, 1536  ;;  %p611_p4 = scmp.lt.s32.totalorder %s799_s8, %s609_s5 }
  0x34   : > { %p606_p2 = pnand %p604_p10, %p592_p5  ;;  %p612_p11 = scmp.lt.s32.totalorder %s610_s6, %s603_s27 }
  0x36   : > { %p607_p0 = pneg %p606_p2  ;;  %p613_p6 = por %p612_p11, %p611_p4 }
  0x38   : > { %p614_p13 = pnand %p613_p6, %p607_p0 }
  0x3a   : > { %617 = shalt.err (!%p614_p13)
}
  0x3b   : > { %s690_s7 = smov 384   ;;  %s691_s14 = smov 24  }
  0x3c   : > { %518 = dma.hbm_to_vmem [thread:$0]  (!%p787_p3), %s804_s17, 768, %s799_s8, %s806_s19, %s690_s7, %s690_s7, %s691_s14  }
  0x3d   : > { %p913_p5 = scmp.ne.s32.totalorder %s909_s23, 0 }
  0x3e   : > { %s830_s16 = sand.u32 (!%p913_p5), 1, %s678_s10   ;;  %p914_p6 = scmp.ne.s32.totalorder (!%p913_p5), %s906_s20, 0 }
  0x3f   : > { %144 = sbr.rel (%p913_p5) target bundleno = 307 (0x133), region = 28  ;;  %s147_s25 = scalar_lea.sflag (!%p913_p5), [#allocation3], %s830_s16 }
  0x40   : > { %s502_s24 = smul.u32 (!%p913_p5), 48, %s830_s16 }
  0x42   : > { %s150_s26 = scalar_lea.vmem (!%p913_p5), [#allocation2], %s502_s24 }
  0x44   : > { %661 = dma.done.wait (%p914_p6), %s147_s25, 768  }
  0x45   : > { %663 = vsyncadd (%p914_p6), %s147_s25, 4294966528  ;;  %p915_p13 = scmp.eq.s32.totalorder %s731_s13, 0 }
  0x47   : > { %665 = dma.done.wait (%p915_p13), [#allocation6], 48   ;;  %p916_p3 = pmov %p915_p13 }
  0x48   : > { %v183_v0 = vlaneseq  ;;  %v179_v5 = vld [vmem:[%s150_s26 + $0x20] sm:$0xff]  ;;  %v180_v7 = vld [vmem:[%s150_s26 + $0x28] sm:$0xff]  ;;  %v178_v10 = vld [vmem:[%s150_s26 + $0x18] sm:$0xff]  ;;  %vm210_vm0 = vcmask 359424   ;;  %s478_s20 = sshll.u32 %s830_s16, 4  ;;  %s488_s8 = sshll.u32 %s731_s13, 8 }
  0x49   : > { %667 = vsyncadd (%p916_p3), [#allocation6], 4294967248  ;;  %v181_v6 = vld [vmem:[#allocation5] sm:$0x7]  ;;  %v176_v12 = vld [vmem:[%s150_s26 + $0x8] sm:$0xff]  ;;  %s174_s23 = scalar_lea.vmem [#allocation7], %s478_s20  ;;  %s855_s29 = scalar_lea.hbm %s900_s2, %s488_s8 }
  0x4a   : > { %v184_v1 = vshrl.u32 %v183_v0, 7  ;;  %v177_v13 = vld [vmem:[%s150_s26 + $0x10] sm:$0xff]  ;;  %v175_v14 = vld [vmem:[%s150_s26] sm:$0xff]  ;;  %s388_s28 = sshll.u32 %s174_s23, 4  ;;  %vm371_vm1 = vcmask 130048   ;;  %s375_s13 = scalar_lea.sflag [#allocation4], %s830_s16  ;;  %s850_s28 = int_to_ptr.vmem [resolvable:$true] %s388_s28 }
  0x4b   : > { %s618_s30 = scalar_lea.vmem %s850_s28, 256  ;;  %p917_p1 = scmp.ne.s32.totalorder %s907_s21, 0 }
  0x4c   : > { %v189_v2 = vsub.s32 1, %v184_v1  ;;  %v193_v3 = vsub.s32 2, %v184_v1  ;;  %v185_v4 = vsub.s32 0, %v184_v1  ;;  %p619_p12 = scmp.ne.s32.totalorder %s850_s28, %s618_s30  ;;  %s692_s3 = smov [#allocation7]  }
  0x4d   : > { %s622_s27 = sshll.u32 %s692_s3, 4  ;;  %s623_s27 = int_to_ptr.vmem [resolvable:$false] %s622_s27 }
  0x4e   : > { %v190_v8 = vrot.slane %v181_v6, %v189_v2  ;;  %v194_v9 = vrot.slane %v181_v6, %v193_v3  ;;  %v186_v11 = vrot.slane %v181_v6, %v185_v4  ;;  %p620_p7 = pnand %p619_p12, %p917_p1  ;;  %s624_s4 = scalar_lea.vmem %s623_s27, 512 }
  0x4f   : > { %p625_p9 = scmp.lt.s32.totalorder %s850_s28, %s623_s27  ;;  %p626_p10 = scmp.lt.s32.totalorder %s624_s4, %s618_s30 }
  0x50   : > { %v202_v15 = vmul.f32 %v190_v8, %v179_v5  ;;  %v203_v16 = vmul.f32 %v194_v9, %v180_v7  ;;  %v201_v17 = vmul.f32 %v186_v11, %v178_v10  ;;  %v199_v18 = vmul.f32 %v190_v8, %v176_v12  ;;  %p621_p8 = pneg %p620_p7 }
  0x51   : > { %v200_v19 = vmul.f32 %v194_v9, %v177_v13  ;;  %v198_v20 = vmul.f32 %v186_v11, %v175_v14  ;;  %p627_p2 = por %p626_p10, %p625_p9 }
  0x52   : > { %v208_v21 = vmax.f32 %v202_v15, 0.0  ;;  %v209_v22 = vmax.f32 %v203_v16, 0.0  ;;  %v207_v23 = vmax.f32 %v201_v17, 0.0  ;;  %v205_v24 = vmax.f32 %v199_v18, 0.0 }
  0x53   : > { %v206_v25 = vmax.f32 %v200_v19, 0.0  ;;  %v204_v26 = vmax.f32 %v198_v20, 0.0  ;;  %p628_p0 = pnand %p627_p2, %p621_p8 }
  0x54   : > { %245 = vmatprep.subr.mxu0 %v208_v21  ;;  %493 = vmatprep.subr.msk.mxu1 %vm210_vm0, %v209_v22 }
  0x55   : > { %246 = vmatpush1.xpose.msra.mxu0 %v207_v23  ;;  %494 = vmatpush3.xpose.msk.msra.mxu1 %vm210_vm0, %v209_v22 }
  0x56   : > { %247 = vmatprep.subr.mxu0 %v205_v24  ;;  %495 = vmatprep.subr.msk.mxu1 %vm210_vm0, %v206_v25 }
  0x57   : > { %281 = vmatprep.mubr.f32.mxu0 %v205_v24  ;;  %497 = vmatprep.mubr.msk.f32.mxu1 %vm210_vm0, %v206_v25 }
  0x59   : > { %248 = vmatpush1.xpose.msra.mxu0 %v204_v26  ;;  %496 = vmatpush3.xpose.msk.msra.mxu1 %vm210_vm0, %v206_v25 }
  0x5c   : > { %282 = vmatmul.mubr.f32.vlgmr.msra.gmra.mxu0 %v204_v26  ;;  %498 = vmatmul.mubr.msk.f32.vlgmr.msra.gmra.mxu1 %vm210_vm0, %v209_v22 }
  0x5d   : > { %286 = vmatprep.mubr.f32.mxu0 %v208_v21 }
  0x60   : > { %287 = vmatmul.mubr.f32.gmra.mxu0 %v207_v23 }
 0x11c   : > { %v283_v27 = vpop.f32.mrf.mxu0  ;;  %v499_v28 = vpop.f32.mrf.mxu1 }
 0x11e   : > { %v285_v29 = vpop.f32.mrf.mxu0  ;;  %v358_v30 = vpop.f32.mrf.mxu1 }
 0x11f   : > { %v359_v31 = vadd.f32 %v358_v30, %v283_v27 }
 0x120   : > { %v288_v32 = vpop.f32.mrf.mxu0 }
 0x121   : > { %vm367_vm2 = vcmp.ge.f32.partialorder %v359_v31, 0.1  ;;  %v364_v33 = vadd.f32 %v499_v28, %v288_v32 }
 0x122   : > { %v369_v34 = vsel %vm367_vm2, %v359_v31, 0.0  ;;  %v290_v35 = vpop.f32.mrf.mxu0 }
 0x123   : > { %372 = vst.msk [vmem:[%s174_s23] sm:$0xff] %vm371_vm1, %v369_v34  ;;  %vm368_vm3 = vcmp.ge.f32.partialorder %v364_v33, 0.1 }
 0x124   : > { %v370_v36 = vsel %vm368_vm3, %v364_v33, 0.0 }
 0x125   : > { %373 = vst.msk [vmem:[%s174_s23 + $0x8] sm:$0xff] %vm371_vm1, %v370_v36 }
 0x126   : > { %631 = shalt.err (!%p628_p0)
}
 0x127   : > { %s632_s5 = scalar_lea.hbm %s855_s29, 256  ;;  %s636_s14 = scalar_lea.hbm %s900_s2, 512 }
 0x128   : > { %p633_p4 = scmp.ne.s32.totalorder %s855_s29, %s632_s5  ;;  %p637_p6 = scmp.lt.s32.totalorder %s855_s29, %s900_s2 }
 0x129   : > { %p638_p13 = scmp.lt.s32.totalorder %s636_s14, %s632_s5 }
 0x12a   : > { %p634_p11 = pnand %p633_p4, %p917_p1 }
 0x12b   : > { %p639_p3 = por %p638_p13, %p637_p6 }
 0x12c   : > { %p635_p5 = pneg %p634_p11 }
 0x12e   : > { %p640_p12 = pnand %p639_p3, %p635_p5 }
 0x130   : > { %643 = shalt.err (!%p640_p12)
}
 0x131   : > { %s693_s26 = smov 128   ;;  %s694_s20 = smov 8  }
 0x132   : > { %509 = dma.vmem_to_hbm [thread:$0]  (%p917_p1), %s850_s28, 256, %s855_s29, %s375_s13, %s693_s26, %s693_s26, %s694_s20  }
 0x133 PF: > { %s403_s23 = sand.u32 1, %s674_s9   ;;  %p918_p7 = scmp.ne.s32.totalorder %s908_s22, 0 }
 0x134   : > { %p919_p8 = scmp.ge.s32.totalorder %s686_s12, 2  ;;  %s404_s8 = scalar_lea.sflag [#allocation4], %s403_s23 }
 0x136   : > { %p520_p9 = pnand %p919_p8, %p918_p7 }
 0x138   : > { %p521_p10 = pneg %p520_p9 }
 0x13a   : > { %669 = dma.done.wait (%p521_p10), %s404_s8, 256  }
 0x13b   : > { %671 = vsyncadd (%p521_p10), %s404_s8, 4294967040  ;;  %p16_p2 = scmp.ge.s32.totalorder %s735_s15, 4   ;;  %s920_s9 = smov %s678_s10 }
 0x13c   : > { %s921_s10 = smov %s682_s11  ;;  %s922_s11 = smov %s747_s18 }
 0x13d   : > { %s923_s12 = smov %s735_s15  ;;  %18 = sbr.rel (!%p16_p2) target bundleno = 6 (0x6), region = 77 }
 0x142   :  { %409 = vsyncpa [#allocation3], 1 }
 0x143   :  { %411 = vsyncpa [#allocation3 + $0x1], 1 }
 0x144   :  { %412 = vsyncpa [#allocation6], 1 }
 0x145   :  { %413 = vsyncpa [#allocation4], 1 }
 0x146   :  { %415 = vsyncpa [#allocation4 + $0x1], 1 }

</bundles_post_ra>
